<compile_context>
chip_gen: v7x
topology: tpu7x:2x2x1
jax: 0.10.0
libtpu: 0.0.40
codegen_flags: <defaults>
</compile_context>

<pallas_src>
import math

import jax
import jax.numpy as jnp
from jax import lax
from jax.experimental import pallas as pl
from jax.experimental.pallas import tpu as pltpu


def _round_up(n, m):
    return ((n + m - 1) // m) * m


def make_snp_kernel(T, E, B, TB):
    """All arguments are static Python scalars closed over at trace time."""
    t_is_neg_inf = (T == -math.inf)
    has_partial_rows = (B % TB) != 0

    def _recip(s):
        # EUP vrcp + one Newton step (~1e-7 rel error; exact path in interpret).
        r = pl.reciprocal(s, approx=True)
        return r * (2.0 - s * r)

    def snp_kernel(u_ref, x_ref, h_ref, up_ref):
        u = u_ref[...].astype(jnp.float32)          # (1, E)   previous state
        x = x_ref[...].astype(jnp.float32)          # (TB, E)  input tile
        x2 = u + x                                  # x = self.u + x

        if t_is_neg_inf:
            # where(x2 > -inf, x2, 0) == x2 ; not_need == 0
            need = x2
            m1 = jnp.max(need, axis=-1, keepdims=True)
            e1 = jnp.exp(need - m1)                 # (TB, E)
            s1 = jnp.sum(e1, axis=-1, keepdims=True)
            g = e1 * _recip(s1)
            contrib = need - g
            # h = softmax(u + x2) = softmax(need + u): reuse e1,
            #   exp(need + u - (m1 + max(u))) = e1 * exp(u - max(u))
            # Both shift terms are <= 0, so no overflow.
            eu = jnp.exp(u - jnp.max(u, axis=-1, keepdims=True))   # (1, E)
            eh = e1 * eu
            sh = jnp.sum(eh, axis=-1, keepdims=True)
            h = eh * _recip(sh)
        else:
            zero = jnp.zeros_like(x2)
            need = jnp.where(x2 > T, x2, zero)
            not_need = jnp.where(x2 < T, x2, zero)
            m1 = jnp.max(need, axis=-1, keepdims=True)
            e1 = jnp.exp(need - m1)
            s1 = jnp.sum(e1, axis=-1, keepdims=True)
            g = e1 * _recip(s1)
            contrib = (need - g) + not_need
            z = u + x2
            m2 = jnp.max(z, axis=-1, keepdims=True)
            e2 = jnp.exp(z - m2)
            s2 = jnp.sum(e2, axis=-1, keepdims=True)
            h = e2 * _recip(s2)

        # Mask out-of-range rows of the last (possibly partial) tile before the
        # partial sum.  (Their garbage values may be NaN/inf; jnp.where selects
        # them away, and their h writes are dropped by Pallas.)
        if has_partial_rows:
            row = lax.broadcasted_iota(jnp.int32, (TB, 1), 0)
            global_row = pl.program_id(0) * TB + row
            contrib = jnp.where(global_row < B, contrib, 0.0)

        # Per-tile partial sum over the batch rows; wrapper finishes the mean.
        up_ref[...] = jnp.sum(contrib, axis=0, keepdims=True).reshape(1, 1, E)

        # h = softmax(self.u + x2) over the last dim (old u).
        h_ref[...] = h.astype(h_ref.dtype)

    return snp_kernel


def snp_forward(x, u=None, T=-math.inf, max_block_rows=1024):
    """Pallas implementation of SNPModule1.forward. Returns (h, u_new)."""
    B, E = x.shape
    io_dtype = x.dtype
    if not jnp.issubdtype(io_dtype, jnp.floating):
        x = x.astype(jnp.float32)
        io_dtype = jnp.dtype(jnp.float32)
    if u is None:
        # torch.zeros_like(x).mean(0) -> zeros of shape (E,); kept as (1, E).
        u = jnp.zeros((1, E), dtype=io_dtype)
    u = jnp.reshape(u, (1, E)).astype(io_dtype)

    elem_bytes = jnp.dtype(io_dtype).itemsize

    # VMEM accounting per tile row: double-buffered x-in + h-out pipeline copies
    # (2 * 2 * elem_bytes * E) plus ~6 f32 temporaries (x2, need, e1, g/contrib,
    # eh/e2, h) materialized by Mosaic.  Budget kept conservative so it fits
    # v5e's raised scoped limit and v7x's 64 MiB physical VMEM.
    bytes_per_row = (4 * elem_bytes + 6 * 4) * E
    vmem_tile_budget = 36 * 1024 * 1024
    tb_budget = max(8, ((vmem_tile_budget // bytes_per_row) // 8) * 8)

    # Ensure the parallel batch axis has at least 2 tiles when B allows it
    # (keeps both TensorCores busy on v7x megacore).
    if B > 8:
        tb_mc = max(8, _round_up(pl.cdiv(B, 2), 8))
    else:
        tb_mc = 8

    TB = max(8, min(max_block_rows, tb_budget, tb_mc, _round_up(B, 8)))
    TB = (TB // 8) * 8

    nb = pl.cdiv(B, TB)

    kernel = make_snp_kernel(float(T), E, B, TB)

    h, u_part = pl.pallas_call(
        kernel,
        grid=(nb,),
        out_shape=(
            jax.ShapeDtypeStruct((B, E), io_dtype),          # h
            jax.ShapeDtypeStruct((nb, 1, E), jnp.float32),    # per-tile partial sums
        ),
        in_specs=[
            pl.BlockSpec((1, E), lambda i: (0, 0)),           # u (resident)
            pl.BlockSpec((TB, E), lambda i: (i, 0)),          # x tile
        ],
        out_specs=(
            pl.BlockSpec((TB, E), lambda i: (i, 0)),          # h tile
            pl.BlockSpec((1, 1, E), lambda i: (i, 0, 0)),     # u partial sum
        ),
        compiler_params=pltpu.CompilerParams(
            dimension_semantics=("parallel",),                # no revisited output
            vmem_limit_bytes=48 * 1024 * 1024,
        ),
        cost_estimate=pl.CostEstimate(
            flops=12 * B * E,
            transcendentals=2 * B * E,
            bytes_accessed=elem_bytes * (2 * B * E + E) + 4 * nb * E,
        ),
    )(u, x)

    u_new = (jnp.sum(u_part[:, 0, :], axis=0, keepdims=True) / B).astype(io_dtype)
    return h, u_new


def _reference(x, u, T):
    """Pure-JAX reference of the same forward pass for a correctness check."""
    x = x.astype(jnp.float32)
    u = u.astype(jnp.float32)
    x2 = u + x
    need = jnp.where(x2 > T, x2, 0.0)
    not_need = jnp.where(x2 < T, x2, 0.0)
    g = jax.nn.softmax(need, axis=-1)
    u_new = jnp.mean(need - g + not_need, axis=0, keepdims=True)
    h = jax.nn.softmax(u + x2, axis=-1)
    return h, u_new


if __name__ == "__main__":
    key = jax.random.PRNGKey(0)
    k1, k2, k3 = jax.random.split(key, 3)

    # Test 1: module defaults — zero state, T = -inf, small E (32, not a
    # multiple of 128 -> full-E block, masked lane stores).
    B1, E1 = 8, 32
    x1 = jax.random.normal(k1, (B1, E1), dtype=jnp.float32)
    h1, u1 = snp_forward(x1)
    h1 = jax.block_until_ready(h1)
    u1 = jax.block_until_ready(u1)
    h1_ref, u1_ref = _reference(x1, jnp.zeros((1, E1), jnp.float32), -math.inf)
    assert h1.shape == (B1, E1) and u1.shape == (1, E1)
    assert jnp.allclose(h1, h1_ref, atol=1e-5, rtol=1e-5)
    assert jnp.allclose(u1, u1_ref, atol=1e-5, rtol=1e-5)

    # Test 2: finite T, non-zero state, ragged B/E -> exercises multi-tile grid,
    # the partial last block (row masking of the partial sums), and a non-128
    # embed dim simultaneously.
    B2, E2, T2 = 37, 200, 0.25
    x2 = jax.random.normal(k2, (B2, E2), dtype=jnp.float32)
    u2 = 0.1 * jax.random.normal(k3, (1, E2), dtype=jnp.float32)
    h2, u2n = snp_forward(x2, u=u2, T=T2, max_block_rows=16)
    h2 = jax.block_until_ready(h2)
    u2n = jax.block_until_ready(u2n)
    h2_ref, u2n_ref = _reference(x2, u2, T2)
    assert h2.shape == (B2, E2) and u2n.shape == (1, E2)
    assert jnp.allclose(h2, h2_ref, atol=1e-5, rtol=1e-5)
    assert jnp.allclose(u2n, u2n_ref, atol=1e-5, rtol=1e-5)

    print("KERNEL_OK")
</pallas_src>

<mosaic_0001>
module attributes {stable_mosaic.version = 11 : i64} {
  func.func @snp_kernel(%arg0: i32, %arg1: memref<1x32xf32, #tpu.memory_space<vmem>>, %arg2: memref<8x32xf32, #tpu.memory_space<vmem>>, %arg3: memref<8x32xf32, #tpu.memory_space<vmem>>, %arg4: memref<1x1x32xf32, #tpu.memory_space<vmem>>) attributes {dimension_semantics = [#tpu.dimension_semantics<parallel>], iteration_bounds = array<i64: 1>, scalar_prefetch = 0 : i64, scratch_operands = 0 : i64, tpu.core_type = #tpu.core_type<tc>, window_params = [{pipeline_mode = #tpu.pipeline_mode<synchronous>, transform_indices = @transform_0, window_bounds = array<i64: 1, 32>}, {transform_indices = @transform_1, window_bounds = array<i64: 8, 32>}, {transform_indices = @transform_2, window_bounds = array<i64: 8, 32>}, {transform_indices = @transform_3, window_bounds = array<i64: 1, 1, 32>}]} {
    %c0 = arith.constant 0 : index
    %c0_0 = arith.constant 0 : index
    %0 = vector.load %arg1[%c0, %c0_0] : memref<1x32xf32, #tpu.memory_space<vmem>>, vector<1x32xf32>
    %c0_1 = arith.constant 0 : index
    %c0_2 = arith.constant 0 : index
    %1 = vector.load %arg2[%c0_1, %c0_2] : memref<8x32xf32, #tpu.memory_space<vmem>>, vector<8x32xf32>
    %2 = vector.broadcast %0 : vector<1x32xf32> to vector<8x32xf32>
    %3 = arith.addf %2, %1 : vector<8x32xf32>
    %cst = arith.constant dense<0xFF800000> : vector<8xf32>
    %4 = vector.multi_reduction <maximumf>, %3, %cst [1] : vector<8x32xf32> to vector<8xf32>
    %5 = vector.shape_cast %4 : vector<8xf32> to vector<8x1xf32>
    %6 = vector.broadcast %5 : vector<8x1xf32> to vector<8x32xf32>
    %7 = arith.subf %3, %6 : vector<8x32xf32>
    %8 = math.exp %7 : vector<8x32xf32>
    %cst_3 = arith.constant dense<0.000000e+00> : vector<8xf32>
    %9 = vector.multi_reduction <add>, %8, %cst_3 [1] : vector<8x32xf32> to vector<8xf32>
    %10 = vector.shape_cast %9 : vector<8xf32> to vector<8x1xf32>
    %11 = tpu.reciprocal %10 {approx = true} : vector<8x1xf32> -> vector<8x1xf32>
    %12 = arith.mulf %10, %11 : vector<8x1xf32>
    %cst_4 = arith.constant 2.000000e+00 : f32
    %13 = vector.broadcast %cst_4 : f32 to vector<8x1xf32>
    %14 = arith.subf %13, %12 : vector<8x1xf32>
    %15 = arith.mulf %11, %14 : vector<8x1xf32>
    %16 = vector.broadcast %15 : vector<8x1xf32> to vector<8x32xf32>
    %17 = arith.mulf %8, %16 : vector<8x32xf32>
    %18 = arith.subf %3, %17 : vector<8x32xf32>
    %cst_5 = arith.constant dense<0xFF800000> : vector<1xf32>
    %19 = vector.multi_reduction <maximumf>, %0, %cst_5 [1] : vector<1x32xf32> to vector<1xf32>
    %20 = vector.shape_cast %19 : vector<1xf32> to vector<1x1xf32>
    %21 = vector.broadcast %20 : vector<1x1xf32> to vector<1x32xf32>
    %22 = arith.subf %0, %21 : vector<1x32xf32>
    %23 = math.exp %22 : vector<1x32xf32>
    %24 = vector.broadcast %23 : vector<1x32xf32> to vector<8x32xf32>
    %25 = arith.mulf %8, %24 : vector<8x32xf32>
    %cst_6 = arith.constant dense<0.000000e+00> : vector<8xf32>
    %26 = vector.multi_reduction <add>, %25, %cst_6 [1] : vector<8x32xf32> to vector<8xf32>
    %27 = vector.shape_cast %26 : vector<8xf32> to vector<8x1xf32>
    %28 = tpu.reciprocal %27 {approx = true} : vector<8x1xf32> -> vector<8x1xf32>
    %29 = arith.mulf %27, %28 : vector<8x1xf32>
    %cst_7 = arith.constant 2.000000e+00 : f32
    %30 = vector.broadcast %cst_7 : f32 to vector<8x1xf32>
    %31 = arith.subf %30, %29 : vector<8x1xf32>
    %32 = arith.mulf %28, %31 : vector<8x1xf32>
    %33 = vector.broadcast %32 : vector<8x1xf32> to vector<8x32xf32>
    %34 = arith.mulf %25, %33 : vector<8x32xf32>
    %cst_8 = arith.constant dense<0.000000e+00> : vector<32xf32>
    %35 = vector.multi_reduction <add>, %18, %cst_8 [0] : vector<8x32xf32> to vector<32xf32>
    %36 = vector.shape_cast %35 : vector<32xf32> to vector<1x32xf32>
    %37 = vector.shape_cast %36 : vector<1x32xf32> to vector<1x1x32xf32>
    %c0_9 = arith.constant 0 : index
    %c0_10 = arith.constant 0 : index
    %c0_11 = arith.constant 0 : index
    %38 = vector.load %arg4[%c0_9, %c0_10, %c0_11] : memref<1x1x32xf32, #tpu.memory_space<vmem>>, vector<1x1x32xf32>
    tpu.vector_store %arg4[%c0_9, %c0_10, %c0_11], %37 {strides = array<i32>} : memref<1x1x32xf32, #tpu.memory_space<vmem>>, vector<1x1x32xf32>,
    %c0_12 = arith.constant 0 : index
    %c0_13 = arith.constant 0 : index
    %39 = vector.load %arg3[%c0_12, %c0_13] : memref<8x32xf32, #tpu.memory_space<vmem>>, vector<8x32xf32>
    tpu.vector_store %arg3[%c0_12, %c0_13], %34 {strides = array<i32>} : memref<8x32xf32, #tpu.memory_space<vmem>>, vector<8x32xf32>,
    return
  }
  func.func @transform_0(%arg0: i32) -> (i32, i32) {
    %c0_i32 = arith.constant 0 : i32
    %c0_i32_0 = arith.constant 0 : i32
    %c0_i32_1 = arith.constant 0 : i32
    return %c0_i32, %c0_i32_0 : i32, i32
  }
  func.func @transform_1(%arg0: i32) -> (i32, i32) {
    %c0_i32 = arith.constant 0 : i32
    %c0_i32_0 = arith.constant 0 : i32
    return %arg0, %c0_i32 : i32, i32
  }
  func.func @transform_2(%arg0: i32) -> (i32, i32) {
    %c0_i32 = arith.constant 0 : i32
    %c0_i32_0 = arith.constant 0 : i32
    return %arg0, %c0_i32 : i32, i32
  }
  func.func @transform_3(%arg0: i32) -> (i32, i32, i32) {
    %c0_i32 = arith.constant 0 : i32
    %c0_i32_0 = arith.constant 0 : i32
    %c0_i32_1 = arith.constant 0 : i32
    return %arg0, %c0_i32, %c0_i32_0 : i32, i32, i32
  }
}

</mosaic_0001>

<bundles_post_ra>
// kernel: tpu_custom_call.1
= control target key start
LH: loop header
LB: loop body
LE: loop exit
PB: predicated region body
PF: predicated region fallthrough
CT: control target
= control target key end

     0   :  { %9 = vsyncpa [#allocation3], 0  ;;  %s312_s0 = inlined_call_operand.hbm [shape: f32[1,32], index: 0, kind: input, shape index: {}]   ;;  %s313_s1 = inlined_call_operand.hbm [shape: f32[8,32], index: 1, kind: input, shape index: {}]   ;;  %s314_s2 = inlined_call_operand.hbm [shape: f32[8,32], index: 2, kind: output, shape index: {0}]   ;;  %s315_s3 = inlined_call_operand.hbm [shape: f32[1,1,32], index: 3, kind: output, shape index: {1}]  }
   0x1   :  { %10 = vsyncpa [#allocation6], 0 }
   0x2   :  { %11 = vsyncpa [#allocation4], 0 }
   0x3   :  { %12 = vsyncpa [#allocation9], 0  ;;  %s233_s12 = smov [#allocation2]   ;;  %s234_s14 = smov [#allocation5]  }
   0x4   :  { %s19_s13 = sshll.u32 %s233_s12, 4  ;;  %s29_s15 = sshll.u32 %s234_s14, 4  ;;  %s20_s13 = int_to_ptr.vmem [resolvable:$true] %s19_s13  ;;  %s30_s15 = int_to_ptr.vmem [resolvable:$true] %s29_s15 }
   0x5   :  { %s137_s18 = scalar_lea.hbm %s312_s0, 16 }
   0x6   :  { %p138_p0 = scmp.ne.s32.totalorder %s312_s0, %s137_s18  ;;  %p141_p1 = scmp.lt.u32.totalorder %s137_s18, %s312_s0 }
   0x8   :  { %p143_p2 = pnand %p141_p1, %p138_p0 }
   0xa   :  { %146 = shalt.err (!%p143_p2)
}
   0xb   :  { %s147_s23 = scalar_lea.vmem %s20_s13, 16  ;;  %s151_s24 = scalar_lea.vmem %s20_s13, 32 }
   0xc   :  { %p148_p3 = scmp.ne.s32.totalorder %s20_s13, %s147_s23  ;;  %p152_p4 = scmp.lt.s32.totalorder %s20_s13, %s20_s13 }
   0xd   :  { %p153_p5 = scmp.lt.s32.totalorder %s151_s24, %s147_s23 }
   0xf   :  { %p154_p6 = por %p153_p5, %p152_p4 }
  0x11   :  { %p155_p7 = pnand %p154_p6, %p148_p3 }
  0x13   :  { %158 = shalt.err (!%p155_p7)
}
  0x14   :  { %22 = dma.hbm_to_vmem [thread:$0]  %s312_s0, 16, %s20_s13, [#allocation3]  }
  0x15   :  { %s159_s29 = scalar_lea.hbm %s313_s1, 128 }
  0x16   :  { %p160_p8 = scmp.ne.s32.totalorder %s313_s1, %s159_s29  ;;  %p163_p9 = scmp.lt.u32.totalorder %s159_s29, %s313_s1 }
  0x18   :  { %p165_p10 = pnand %p163_p9, %p160_p8 }
  0x1a   :  { %168 = shalt.err (!%p165_p10)
}
  0x1b   :  { %s169_s7 = scalar_lea.vmem %s30_s15, 128  ;;  %p174_p12 = scmp.lt.s32.totalorder %s30_s15, %s30_s15 }
  0x1c   :  { %p170_p11 = scmp.ne.s32.totalorder %s30_s15, %s169_s7  ;;  %p175_p13 = scmp.lt.s32.totalorder %s169_s7, %s169_s7 }
  0x1e   :  { %p176_p0 = por %p175_p13, %p174_p12 }
  0x20   :  { %p177_p1 = pnand %p176_p0, %p170_p11 }
  0x22   :  { %180 = shalt.err (!%p177_p1)
}
  0x23   :  { %32 = dma.hbm_to_vmem [thread:$0]  %s313_s1, 128, %s30_s15, [#allocation6]  }
  0x24   :  { %225 = dma.done.wait [#allocation3], 16  }
  0x25   :  { %226 = vsyncadd [#allocation3], 4294967280 }
  0x26   :  { %227 = dma.done.wait [#allocation6], 128  }
  0x27   :  { %228 = vsyncadd [#allocation6], 4294967168  ;;  %v42_v0 = vlaneseq  ;;  %v39_v3 = vld [vmem:[#allocation2] sm:$0x1]  ;;  %v40_v4 = vld [vmem:[#allocation5] sm:$0xff]  ;;  %vm48_vm0 = vcmask 261120  }
  0x28   :  { %vm64_vm1 = vcmask 253952   ;;  %s235_s1 = smov [#allocation7]  }
  0x29   :  { %v43_v1 = vshrl.u32 %v42_v0, 7  ;;  %v65_v8 = vsel %vm64_vm1, %v39_v3, -inf  ;;  %s101_s9 = sshll.u32 %s235_s1, 4  ;;  %s102_s9 = int_to_ptr.vmem [resolvable:$true] %s101_s9 }
  0x2a   :  { %s181_s10 = scalar_lea.vmem %s102_s9, 128  ;;  %p186_p3 = scmp.lt.s32.totalorder %s102_s9, %s102_s9 }
  0x2b   :  { %v44_v2 = vsub.s32 0, %v43_v1  ;;  %p182_p2 = scmp.ne.s32.totalorder %s102_s9, %s181_s10  ;;  %p187_p4 = scmp.lt.s32.totalorder %s181_s10, %s181_s10 }
  0x2d   :  { %v45_v5 = vrot.slane %v39_v3, %v44_v2  ;;  %p188_p5 = por %p187_p4, %p186_p3 }
  0x2f   :  { %v47_v6 = vadd.f32 %v45_v5, %v40_v4  ;;  %p189_p6 = pnand %p188_p5, %p182_p2 }
  0x31   :  { %v49_v7 = vsel %vm48_vm0, %v47_v6, -inf }
  0x32   :  { %50 = vmax.xlane.f32.xlu0 %v49_v7 }
  0x36   :  { %66 = vmax.xlane.f32.xlu0 %v65_v8 }
  0xbf   :  { %v51_v9 = vpop.xlane.xlu0 %50 }
  0xc0   :  { %v52_v10 = vsub.f32 %v47_v6, %v51_v9 }
  0xc2   :  { %v53_v11 = vmul.f32 1.442695, %v52_v10 }
  0xc3   :  { %v67_v12 = vpop.xlane.xlu0 %66 }
  0xc4   :  { %129 = vpow2.f32 %v53_v11  ;;  %v68_v13 = vsub.f32 %v39_v3, %v67_v12 }
  0xc6   :  { %v69_v14 = vmul.f32 1.442695, %v68_v13 }
  0xc8   :  { %131 = vpow2.f32 %v69_v14 }
  0xce   :  { %v130_v15 = vpop.eup %129 }
  0xcf   :  { %v55_v16 = vsel %vm48_vm0, %v130_v15, 0.0 }
  0xd0   :  { %56 = vadd.xlane.f32.xlu1 %v55_v16 }
  0xd2   :  { %v132_v17 = vpop.eup %131 }
  0xd3   :  { %v75_v18 = vrot.slane %v132_v17, %v44_v2 }
  0xd5   :  { %v77_v19 = vmul.f32 %v130_v15, %v75_v18 }
  0xd7   :  { %v78_v20 = vsel %vm48_vm0, %v77_v19, 0.0 }
  0xd8   :  { %79 = vadd.xlane.f32.xlu1 %v78_v20 }
 0x15d   :  { %v57_v21 = vpop.xlane.xlu1 %56 }
 0x15e   :  { %133 = vrcp.f32 %v57_v21 }
 0x165   :  { %v80_v22 = vpop.xlane.xlu1 %79 }
 0x166   :  { %135 = vrcp.f32 %v80_v22 }
 0x168   :  { %v134_v23 = vpop.eup %133 }
 0x169   :  { %v59_v24 = vmul.f32 %v134_v23, %v57_v21 }
 0x16b   :  { %v60_v25 = vsub.f32 2.0, %v59_v24 }
 0x16d   :  { %v61_v26 = vmul.f32 %v134_v23, %v60_v25 }
 0x16f   :  { %v62_v27 = vmul.f32 %v130_v15, %v61_v26 }
 0x170   :  { %v136_v28 = vpop.eup %135 }
 0x171   :  { %v63_v29 = vsub.f32 %v47_v6, %v62_v27  ;;  %v82_v30 = vmul.f32 %v136_v28, %v80_v22 }
 0x173   :  { %v86_v31 = vsel %vm48_vm0, %v63_v29, 0.0  ;;  %v83_v32 = vsub.f32 2.0, %v82_v30 }
 0x174   :  { %v87_v33 = vrot.slane %v86_v31, 4 }
 0x175   :  { %v84_v34 = vmul.f32 %v136_v28, %v83_v32 }
 0x176   :  { %v88_v35 = vadd.f32 %v87_v33, %v86_v31 }
 0x177   :  { %v85_v36 = vmul.f32 %v84_v34, %v77_v19 }
 0x178   :  { %v89_v37 = vrot.slane %v88_v35, 2 }
 0x179   :  { %94 = vst.msk [vmem:[#allocation7] sm:$0xff] %vm48_vm0, %v85_v36 }
 0x17a   :  { %192 = shalt.err (!%p189_p6)
}
 0x17b   :  { %s193_s13 = scalar_lea.hbm %s314_s2, 128 }
 0x17c   :  { %p194_p7 = scmp.ne.s32.totalorder %s314_s2, %s193_s13  ;;  %p197_p8 = scmp.lt.u32.totalorder %s193_s13, %s314_s2 }
 0x17e   :  { %p199_p9 = pnand %p197_p8, %p194_p7 }
 0x180   :  { %202 = shalt.err (!%p199_p9)
}
 0x181   :  { %104 = dma.vmem_to_hbm [thread:$0]  %s102_s9, 128, %s314_s2, [#allocation4]   ;;  %v90_v38 = vadd.f32 %v89_v37, %v88_v35 }
 0x182   :  { %s236_s20 = smov [#allocation8]  }
 0x183   :  { %s111_s21 = sshll.u32 %s236_s20, 4  ;;  %v91_v39 = vrot.slane %v90_v38, 1  ;;  %s112_s21 = int_to_ptr.vmem [resolvable:$true] %s111_s21 }
 0x184   :  { %s203_s22 = scalar_lea.vmem %s112_s21, 16  ;;  %s207_s23 = scalar_lea.vmem %s112_s21, 32 }
 0x185   :  { %v92_v40 = vadd.f32 %v91_v39, %v90_v38  ;;  %p204_p10 = scmp.ne.s32.totalorder %s112_s21, %s203_s22  ;;  %p208_p11 = scmp.lt.s32.totalorder %s112_s21, %s112_s21 }
 0x186   :  { %p209_p12 = scmp.lt.s32.totalorder %s207_s23, %s203_s22 }
 0x187   :  { %93 = vst.msk [vmem:[#allocation8] sm:$0x1] %vm64_vm1, %v92_v40 }
 0x188   :  { %p210_p13 = por %p209_p12, %p208_p11 }
 0x18a   :  { %p211_p0 = pnand %p210_p13, %p204_p10 }
 0x18c   :  { %214 = shalt.err (!%p211_p0)
}
 0x18d   :  { %s215_s2 = scalar_lea.hbm %s315_s3, 16 }
 0x18e   :  { %p216_p1 = scmp.ne.s32.totalorder %s315_s3, %s215_s2  ;;  %p219_p2 = scmp.lt.u32.totalorder %s215_s2, %s315_s3 }
 0x190   :  { %p221_p3 = pnand %p219_p2, %p216_p1 }
 0x192   :  { %224 = shalt.err (!%p221_p3)
}
 0x193   :  { %114 = dma.vmem_to_hbm [thread:$0]  %s112_s21, 16, %s315_s3, [#allocation9]  }
 0x194   :  { %229 = dma.done.wait [#allocation4], 128  }
 0x195   :  { %230 = vsyncadd [#allocation4], 4294967168 }
 0x196   :  { %231 = dma.done.wait [#allocation9], 16  }
 0x197   :  { %232 = vsyncadd [#allocation9], 4294967280 }
 0x198   :  { %121 = vsyncpa [#allocation3], 1 }
 0x199   :  { %122 = vsyncpa [#allocation6], 1 }
 0x19a   :  { %123 = vsyncpa [#allocation4], 1 }
 0x19b   :  { %124 = vsyncpa [#allocation9], 1 }

</bundles_post_ra>
